<compile_context>
chip_gen: v5e
topology: v5e:2x2
jax: 0.10.0
libtpu: 0.0.40
codegen_flags: <defaults>
</compile_context>

<pallas_src>
import functools
import math

import jax
import jax.numpy as jnp
import numpy as np
from jax.experimental import pallas as pl
from jax.experimental.pallas import tpu as pltpu


# ------------------------------ Pallas kernel -------------------------------

def _upsampling_kernel(x1_ref, x2_ref, w1c_ref, w1r_ref, w2_ref, b1_ref, b2_ref,
                       y1_ref, y2_ref, *, width):
    """Both deconv branches for one tile of rows (one row = one input pixel, C lanes).

    Branch 1 (down-shift, k=(2,3)):
        y1(a,b) = x(i,j) . w[:,:,a,b+1] + x(i,j+1) . w[:,:,a,0]*[b==1] + bias
    Branch 2 (down-right-shift, k=(2,2)):
        y2(a,b) = x(i,j) . w[:,:,a,b] + bias

    The right neighbour x(i,j+1) is produced in-register (shift the tile up one row);
    tiles are image-row aligned, so rows with j == W-1 (the transposed-conv zero pad)
    are masked to zero.

    Outputs are written ALREADY interleaved over the row phase `a` -- block layout
    (R, a, W, b*Cout) -- so the wrapper's phase interleave is a free reshape, not an
    extra HBM pass.
    """
    x1 = x1_ref[...]                                    # (tm, Cin)
    tm = x1.shape[0]

    # Right-neighbour mask: rows with j == W-1 have no valid neighbour.
    # (tm, 1) only -> negligible VALU work, broadcast over lanes.
    col = jax.lax.broadcasted_iota(jnp.int32, (tm, 1), 0) % width
    keep = col != (width - 1)
    # TODO(synk): swap to pltpu.roll (XLU slot) once its shift convention is verified on
    # this jax version; the jnp.roll copy is fully hidden under the HBM DMA here.
    xr = jnp.where(keep, jnp.roll(x1, -1, axis=0), jnp.zeros_like(x1))

    # Branch 1: two accumulating dots (no concatenated LHS copy); f32 MXU accumulation.
    acc1 = jnp.dot(x1, w1c_ref[...], preferred_element_type=jnp.float32)
    acc1 = acc1 + jnp.dot(xr, w1r_ref[...], preferred_element_type=jnp.float32)
    acc1 = acc1 + b1_ref[...]                           # (tm, 4*Cout), phase cols a-major
    # Branch 2: plain channel matmul.
    acc2 = jnp.dot(x2_ref[...], w2_ref[...], preferred_element_type=jnp.float32)
    acc2 = acc2 + b2_ref[...]

    half = y1_ref.shape[-1]                             # 2*Cout  (columns = (b, c))
    r = tm // width                                     # image rows in this tile
    # a-phase split + row-block interleave: (tm, 4C) written as (R, 2, W, 2C) in place.
    y1_ref[:, 0:1, :, :] = acc1[:, :half].reshape(r, 1, width, half).astype(y1_ref.dtype)
    y1_ref[:, 1:2, :, :] = acc1[:, half:].reshape(r, 1, width, half).astype(y1_ref.dtype)
    y2_ref[:, 0:1, :, :] = acc2[:, :half].reshape(r, 1, width, half).astype(y2_ref.dtype)
    y2_ref[:, 1:2, :, :] = acc2[:, half:].reshape(r, 1, width, half).astype(y2_ref.dtype)


# ------------------------------- tiling helpers -------------------------------

@functools.lru_cache(maxsize=None)
def _tpu_params():
    """(vmem_capacity_bytes, tensorcores_per_chip) with conservative fallbacks."""
    vmem_cap = 64 * 1024 * 1024          # safe floor (v7x is the smallest at 64 MiB)
    cores = 1
    try:
        info = pltpu.get_tpu_info()
        cap = int(getattr(info, "vmem_capacity_bytes", 0) or 0)
        if cap >= 16 * 1024 * 1024:
            vmem_cap = cap
        for name in ("num_tensorcores", "tensorcore_count", "num_cores", "cores_per_chip"):
            v = getattr(info, name, None)
            if v:
                cores = max(1, int(v))
                break
    except Exception:
        pass
    return vmem_cap, cores


def _tile_rows(m, w, c_in, c_out, itemsize, target_tm):
    """Row-tile size: multiple of lcm(W, sublane packing) (image-row + native-tile
    aligned), sized against a per-generation VMEM budget, preferring exact divisors of M
    (no tail padding -> the post-kernel crop is a no-op), and >= 2 pipelined steps per
    TensorCore on multi-core parts only.  Returns (tm, padded_m, vmem_limit_bytes)."""
    pack = max(8, 32 // itemsize)                  # sublanes per 32-bit row for this dtype
    unit = w * (pack // math.gcd(w, pack))         # lcm(w, pack)
    lane = lambda c: -(-c // 128) * 128
    sub = lambda s: -(-s // pack) * pack

    # Double-buffered VMEM bytes per `unit` input rows: x1,x2 in; y1,y2 out (2 rows each).
    in_b = unit * 2 * 2 * lane(c_in) * itemsize
    out_b = (unit // w) * 2 * 2 * 2 * sub(w) * lane(2 * c_out) * itemsize
    bytes_per_unit = in_b + out_b

    vmem_cap, cores = _tpu_params()
    budget = 24 * 1024 * 1024 if vmem_cap <= 64 * 1024 * 1024 else 48 * 1024 * 1024
    tm_cap = max(unit, (budget // bytes_per_unit) * unit)

    tm = max(unit, (min(target_tm, m, tm_cap) // unit) * unit)
    if cores > 1:                                   # >= 2 pipelined steps per TensorCore
        per_core = ((m // (2 * cores)) // unit) * unit
        if per_core >= unit:
            tm = min(tm, per_core)
    # Prefer a divisor of m within 2x of the chosen size: no tail padding.
    cand = tm
    while cand >= unit and 2 * cand >= tm:
        if m % cand == 0:
            tm = cand
            break
        cand -= unit

    m_padded = -(-m // tm) * tm
    est = bytes_per_unit * (tm // unit) + 4 * 1024 * 1024     # + resident weights & slack
    vmem_limit = min(max(budget, est) + 16 * 1024 * 1024,
                     max(vmem_cap - 8 * 1024 * 1024, 32 * 1024 * 1024),
                     56 * 1024 * 1024)
    return tm, m_padded, int(vmem_limit)


# ------------------------------ fused pallas_call -----------------------------

def _fused_phase_matmul(x1f, x2f, w1c, w1r, w2, b1, b2, *, width, tm, out_dtype,
                        vmem_limit):
    mp, cin = x1f.shape
    cout4 = w2.shape[1]
    half = cout4 // 2
    r = tm // width
    nhp = mp // width
    kernel = functools.partial(_upsampling_kernel, width=width)
    out_sds = jax.ShapeDtypeStruct((nhp, 2, width, half), out_dtype)
    return pl.pallas_call(
        kernel,
        out_shape=(out_sds, out_sds),
        grid_spec=pltpu.PrefetchScalarGridSpec(
            num_scalar_prefetch=0,
            grid=(mp // tm,),
            in_specs=[
                pl.BlockSpec((tm, cin), lambda i: (i, 0)),            # x1 tile
                pl.BlockSpec((tm, cin), lambda i: (i, 0)),            # x2 tile
                pl.BlockSpec((cin, cout4), lambda i: (0, 0)),         # W1 centre (resident)
                pl.BlockSpec((cin, cout4), lambda i: (0, 0)),         # W1 neighbour (resident)
                pl.BlockSpec((cin, cout4), lambda i: (0, 0)),         # W2 (resident)
                pl.BlockSpec((1, cout4), lambda i: (0, 0)),           # b1 (f32, resident)
                pl.BlockSpec((1, cout4), lambda i: (0, 0)),           # b2 (f32, resident)
            ],
            out_specs=(pl.BlockSpec((r, 2, width, half), lambda i: (i, 0, 0, 0)),
                       pl.BlockSpec((r, 2, width, half), lambda i: (i, 0, 0, 0))),
        ),
        compiler_params=pltpu.CompilerParams(
            dimension_semantics=("parallel",),
            vmem_limit_bytes=int(vmem_limit)),
    )(x1f, x2f, w1c, w1r, w2, b1, b2)


# --------------------------- weight packing + wrapper --------------------------

def _pack_down_shift_weights(w, dtype):
    # w: (Cin, Cout, 2, 3). Phase columns a-major: (0,0),(0,1),(1,0),(1,1).
    cin, cout = w.shape[0], w.shape[1]
    wc = jnp.concatenate([w[:, :, 0, 1], w[:, :, 0, 2],
                          w[:, :, 1, 1], w[:, :, 1, 2]], axis=1)        # from pixel (i, j)
    z = jnp.zeros((cin, cout), w.dtype)
    wr = jnp.concatenate([z, w[:, :, 0, 0], z, w[:, :, 1, 0]], axis=1)  # from pixel (i, j+1)
    return wc.astype(dtype), wr.astype(dtype)                           # 2 x (Cin, 4*Cout)


def _pack_down_right_shift_weight(w, dtype):
    # w: (Cin, Cout, 2, 2)
    return jnp.concatenate([w[:, :, 0, 0], w[:, :, 0, 1],
                            w[:, :, 1, 0], w[:, :, 1, 1]], axis=1).astype(dtype)


@functools.partial(jax.jit,
                   static_argnames=("channels_last", "compute_dtype", "target_tm"))
def upsampling_block_forward(x1, x2, w_down, b_down, w_dright, b_dright, *,
                             channels_last=False, compute_dtype=None, target_tm=4096):
    """UpSamplingBlock forward. x1/x2: NCHW (PyTorch layout) or NHWC if channels_last."""
    if not channels_last:
        # TODO(synk): run the surrounding model channels-last end-to-end to also drop
        # these two NHWC<->NCHW HBM passes.
        x1 = jnp.transpose(x1, (0, 2, 3, 1))
        x2 = jnp.transpose(x2, (0, 2, 3, 1))
    n, h, w, cin = x1.shape
    cout = w_down.shape[1]
    cd = jnp.dtype(compute_dtype) if compute_dtype is not None else jnp.dtype(x1.dtype)

    w1c, w1r = _pack_down_shift_weights(w_down, cd)
    w2 = _pack_down_right_shift_weight(w_dright, cd)
    b1 = jnp.tile(b_down.astype(jnp.float32), 4)[None, :]   # added to the f32 accumulator
    b2 = jnp.tile(b_dright.astype(jnp.float32), 4)[None, :]

    m = n * h * w
    x1f = x1.reshape(m, cin).astype(cd)
    x2f = x2.reshape(m, cin).astype(cd)

    tm, mp, vmem_limit = _tile_rows(m, w, cin, cout, jnp.dtype(cd).itemsize, target_tm)
    # The in-register neighbour shift and the in-kernel row-phase interleave both require
    # image-row-aligned tiles; keep this invariant if the tiler changes.
    assert tm % w == 0 and mp % tm == 0 and (mp - m) % w == 0
    if mp != m:    # pad with whole (zero) image rows so every tile stays row-aligned
        x1f = jnp.pad(x1f, ((0, mp - m), (0, 0)))
        x2f = jnp.pad(x2f, ((0, mp - m), (0, 0)))

    y1, y2 = _fused_phase_matmul(x1f, x2f, w1c, w1r, w2, b1, b2,
                                 width=w, tm=tm, out_dtype=cd, vmem_limit=vmem_limit)
    nh = n * h
    # Kernel output is already (N*H, a, W, b, C) in row-major order -> free reshape
    # (the [:nh] crop is a no-op whenever the tile size divides M, which the tiler prefers).
    y1 = y1[:nh].reshape(n, 2 * h, 2 * w, cout)
    y2 = y2[:nh].reshape(n, 2 * h, 2 * w, cout)
    if not channels_last:
        y1 = jnp.transpose(y1, (0, 3, 1, 2))
        y2 = jnp.transpose(y2, (0, 3, 1, 2))
    return y1, y2


class UpSamplingBlock:
    """Forward-only port of the PixelCNN++ UpSamplingBlock (fused Pallas TPU hot path).

    compute_dtype=jnp.bfloat16 (default) halves the dominant HBM streams (recommended on
    v5e/v6e/v7x); matmul accumulation and bias add stay float32.  Pass
    compute_dtype=jnp.float32 for bit-faithful float32 module semantics.
    """
    # TODO(synk): the data-dependent weight-norm `initialize()` of the original module is
    # not reproduced; plain deterministic weights are used (forward semantics identical).

    def __init__(self, num_filters, key, compute_dtype=jnp.bfloat16):
        k1, k2, k3, k4 = jax.random.split(key, 4)
        f = num_filters
        self.w_down = 0.05 * jax.random.normal(k1, (f, f, 2, 3), jnp.float32)
        self.b_down = 0.05 * jax.random.normal(k2, (f,), jnp.float32)
        self.w_dright = 0.05 * jax.random.normal(k3, (f, f, 2, 2), jnp.float32)
        self.b_dright = 0.05 * jax.random.normal(k4, (f,), jnp.float32)
        self.compute_dtype = compute_dtype

    def __call__(self, x1, x2, h=None, *, channels_last=False):
        return upsampling_block_forward(
            x1, x2, self.w_down, self.b_down, self.w_dright, self.b_dright,
            channels_last=channels_last, compute_dtype=self.compute_dtype)


# ---------------------------- pure-JAX reference ----------------------------

def _ref_conv_transpose(x, w, b, stride, out_pad):
    # PyTorch ConvTranspose2d (padding=0): dilated conv with flipped kernel.
    kh, kw = w.shape[2], w.shape[3]
    rhs = jnp.transpose(w[:, :, ::-1, ::-1], (1, 0, 2, 3))  # OIHW (O=Cout)
    y = jax.lax.conv_general_dilated(
        x, rhs, window_strides=(1, 1),
        padding=((kh - 1, kh - 1 + out_pad[0]), (kw - 1, kw - 1 + out_pad[1])),
        lhs_dilation=stride, rhs_dilation=(1, 1),
        dimension_numbers=("NCHW", "OIHW", "NCHW"))
    return y + b[None, :, None, None]


def _ref_down(x, w, b):
    y = _ref_conv_transpose(x, w, b, (2, 2), (1, 1))
    hh, ww = y.shape[2], y.shape[3]
    return y[:, :, : hh - 2 + 1, (3 - 1) // 2: ww - (3 - 1) // 2]


def _ref_down_right(x, w, b):
    y = _ref_conv_transpose(x, w, b, (2, 2), (1, 1))
    hh, ww = y.shape[2], y.shape[3]
    return y[:, :, : hh - 2 + 1, : ww - 2 + 1]


# ---------------------------------- main ------------------------------------

if __name__ == "__main__":
    key = jax.random.PRNGKey(0)
    k_params, k_x1, k_x2 = jax.random.split(key, 3)

    num_filters = 32
    batch, h, w = 2, 8, 8
    x1 = jax.random.normal(k_x1, (batch, num_filters, h, w), jnp.float32)
    x2 = jax.random.normal(k_x2, (batch, num_filters, h, w), jnp.float32)

    # float32 path (exact module semantics)
    block = UpSamplingBlock(num_filters, k_params, compute_dtype=jnp.float32)
    y1, y2 = block(x1, x2)
    jax.block_until_ready((y1, y2))
    assert y1.shape == (batch, num_filters, 2 * h, 2 * w)
    assert y2.shape == (batch, num_filters, 2 * h, 2 * w)

    r1 = _ref_down(x1, block.w_down, block.b_down)
    r2 = _ref_down_right(x2, block.w_dright, block.b_dright)
    np.testing.assert_allclose(np.asarray(y1), np.asarray(r1), rtol=1e-5, atol=1e-5)
    np.testing.assert_allclose(np.asarray(y2), np.asarray(r2), rtol=1e-5, atol=1e-5)

    # channels_last fast path (drops the NCHW<->NHWC wrapper transposes)
    y1c, y2c = block(jnp.transpose(x1, (0, 2, 3, 1)), jnp.transpose(x2, (0, 2, 3, 1)),
                     channels_last=True)
    jax.block_until_ready((y1c, y2c))
    np.testing.assert_allclose(np.asarray(jnp.transpose(y1c, (0, 3, 1, 2))),
                               np.asarray(r1), rtol=1e-5, atol=1e-5)
    np.testing.assert_allclose(np.asarray(jnp.transpose(y2c, (0, 3, 1, 2))),
                               np.asarray(r2), rtol=1e-5, atol=1e-5)

    # default bf16 storage path (recommended on v5e/v6e/v7x): f32 MXU accumulation,
    # halved HBM streams, looser tolerance.
    block_bf16 = UpSamplingBlock(num_filters, k_params)
    y1b, y2b = block_bf16(x1, x2)
    jax.block_until_ready((y1b, y2b))
    np.testing.assert_allclose(np.asarray(y1b.astype(jnp.float32)), np.asarray(r1),
                               rtol=5e-2, atol=5e-2)
    np.testing.assert_allclose(np.asarray(y2b.astype(jnp.float32)), np.asarray(r2),
                               rtol=5e-2, atol=5e-2)

    print("KERNEL_OK")
</pallas_src>

<mosaic_0001>
module attributes {stable_mosaic.version = 11 : i64} {
  func.func @_upsampling_kernel(%arg0: i32, %arg1: memref<128x32xf32, #tpu.memory_space<vmem>>, %arg2: memref<128x32xf32, #tpu.memory_space<vmem>>, %arg3: memref<32x128xf32, #tpu.memory_space<vmem>>, %arg4: memref<32x128xf32, #tpu.memory_space<vmem>>, %arg5: memref<32x128xf32, #tpu.memory_space<vmem>>, %arg6: memref<1x128xf32, #tpu.memory_space<vmem>>, %arg7: memref<1x128xf32, #tpu.memory_space<vmem>>, %arg8: memref<16x2x8x64xf32, #tpu.memory_space<vmem>>, %arg9: memref<16x2x8x64xf32, #tpu.memory_space<vmem>>) attributes {dimension_semantics = [#tpu.dimension_semantics<parallel>], iteration_bounds = array<i64: 1>, scalar_prefetch = 0 : i64, scratch_operands = 0 : i64, tpu.core_type = #tpu.core_type<tc>, window_params = [{transform_indices = @transform_0, window_bounds = array<i64: 128, 32>}, {transform_indices = @transform_1, window_bounds = array<i64: 128, 32>}, {pipeline_mode = #tpu.pipeline_mode<synchronous>, transform_indices = @transform_2, window_bounds = array<i64: 32, 128>}, {pipeline_mode = #tpu.pipeline_mode<synchronous>, transform_indices = @transform_3, window_bounds = array<i64: 32, 128>}, {pipeline_mode = #tpu.pipeline_mode<synchronous>, transform_indices = @transform_4, window_bounds = array<i64: 32, 128>}, {pipeline_mode = #tpu.pipeline_mode<synchronous>, transform_indices = @transform_5, window_bounds = array<i64: 1, 128>}, {pipeline_mode = #tpu.pipeline_mode<synchronous>, transform_indices = @transform_6, window_bounds = array<i64: 1, 128>}, {transform_indices = @transform_7, window_bounds = array<i64: 16, 2, 8, 64>}, {transform_indices = @transform_8, window_bounds = array<i64: 16, 2, 8, 64>}]} {
    %c0 = arith.constant 0 : index
    %c0_0 = arith.constant 0 : index
    %0 = vector.load %arg1[%c0, %c0_0] : memref<128x32xf32, #tpu.memory_space<vmem>>, vector<128x32xf32>
    %1 = tpu.iota {dimensions = array<i32: 0>} : vector<128x1xi32>
    %c8_i32 = arith.constant 8 : i32
    %c0_i32 = arith.constant 0 : i32
    %2 = arith.cmpi eq, %c8_i32, %c0_i32 : i32
    %c1_i32 = arith.constant 1 : i32
    %3 = arith.select %2, %c1_i32, %c8_i32 : i32
    %4 = vector.broadcast %3 : i32 to vector<128x1xi32>
    %5 = arith.remsi %1, %4 : vector<128x1xi32>
    %c0_i32_1 = arith.constant 0 : i32
    %6 = vector.broadcast %c0_i32_1 : i32 to vector<128x1xi32>
    %7 = arith.cmpi ne, %5, %6 : vector<128x1xi32>
    %c0_i32_2 = arith.constant 0 : i32
    %8 = vector.broadcast %c0_i32_2 : i32 to vector<128x1xi32>
    %9 = arith.cmpi slt, %5, %8 : vector<128x1xi32>
    %c0_i32_3 = arith.constant 0 : i32
    %10 = arith.cmpi slt, %3, %c0_i32_3 : i32
    %11 = vector.broadcast %10 : i1 to vector<128x1xi1>
    %12 = vector.broadcast %11 : vector<128x1xi1> to vector<128x1xi1>
    %13 = arith.xori %9, %12 : vector<128x1xi1>
    %14 = arith.andi %13, %7 : vector<128x1xi1>
    %15 = vector.broadcast %3 : i32 to vector<128x1xi32>
    %16 = arith.addi %5, %15 : vector<128x1xi32>
    %17 = arith.select %14, %16, %5 : vector<128x1xi1>, vector<128x1xi32>
    %c7_i32 = arith.constant 7 : i32
    %18 = vector.broadcast %c7_i32 : i32 to vector<128x1xi32>
    %19 = arith.cmpi ne, %17, %18 : vector<128x1xi32>
    %20 = vector.extract_strided_slice %0 {offsets = [1, 0], sizes = [127, 32], strides = [1, 1]} : vector<128x32xf32> to vector<127x32xf32>
    %21 = vector.extract_strided_slice %0 {offsets = [0, 0], sizes = [1, 32], strides = [1, 1]} : vector<128x32xf32> to vector<1x32xf32>
    %22 = tpu.concatenate %20, %21 in 0 : vector<127x32xf32>, vector<1x32xf32> -> vector<128x32xf32>
    %cst = arith.constant 0.000000e+00 : f32
    %23 = vector.broadcast %cst : f32 to vector<128x32xf32>
    %24 = vector.shape_cast %19 : vector<128x1xi1> to vector<128x1xi1>
    %25 = vector.broadcast %24 : vector<128x1xi1> to vector<128x32xi1>
    %26 = arith.select %25, %22, %23 : vector<128x32xi1>, vector<128x32xf32>
    %c0_4 = arith.constant 0 : index
    %c0_5 = arith.constant 0 : index
    %27 = vector.load %arg3[%c0_4, %c0_5] : memref<32x128xf32, #tpu.memory_space<vmem>>, vector<32x128xf32>
    %cst_6 = arith.constant dense<0.000000e+00> : vector<128x128xf32>
    %28 = tpu.matmul %0, %27, %cst_6 {dimension_numbers = #tpu.dot_dimension_numbers<[1], [0], [0], [1], [0, 0, 1, 1], [], []>} : vector<128x32xf32>, vector<32x128xf32>, vector<128x128xf32> -> vector<128x128xf32>
    %c0_7 = arith.constant 0 : index
    %c0_8 = arith.constant 0 : index
    %29 = vector.load %arg4[%c0_7, %c0_8] : memref<32x128xf32, #tpu.memory_space<vmem>>, vector<32x128xf32>
    %cst_9 = arith.constant dense<0.000000e+00> : vector<128x128xf32>
    %30 = tpu.matmul %26, %29, %cst_9 {dimension_numbers = #tpu.dot_dimension_numbers<[1], [0], [0], [1], [0, 0, 1, 1], [], []>} : vector<128x32xf32>, vector<32x128xf32>, vector<128x128xf32> -> vector<128x128xf32>
    %31 = arith.addf %28, %30 : vector<128x128xf32>
    %c0_10 = arith.constant 0 : index
    %c0_11 = arith.constant 0 : index
    %32 = vector.load %arg6[%c0_10, %c0_11] : memref<1x128xf32, #tpu.memory_space<vmem>>, vector<1x128xf32>
    %33 = vector.broadcast %32 : vector<1x128xf32> to vector<128x128xf32>
    %34 = arith.addf %31, %33 : vector<128x128xf32>
    %c0_12 = arith.constant 0 : index
    %c0_13 = arith.constant 0 : index
    %35 = vector.load %arg2[%c0_12, %c0_13] : memref<128x32xf32, #tpu.memory_space<vmem>>, vector<128x32xf32>
    %c0_14 = arith.constant 0 : index
    %c0_15 = arith.constant 0 : index
    %36 = vector.load %arg5[%c0_14, %c0_15] : memref<32x128xf32, #tpu.memory_space<vmem>>, vector<32x128xf32>
    %cst_16 = arith.constant dense<0.000000e+00> : vector<128x128xf32>
    %37 = tpu.matmul %35, %36, %cst_16 {dimension_numbers = #tpu.dot_dimension_numbers<[1], [0], [0], [1], [0, 0, 1, 1], [], []>} : vector<128x32xf32>, vector<32x128xf32>, vector<128x128xf32> -> vector<128x128xf32>
    %c0_17 = arith.constant 0 : index
    %c0_18 = arith.constant 0 : index
    %38 = vector.load %arg7[%c0_17, %c0_18] : memref<1x128xf32, #tpu.memory_space<vmem>>, vector<1x128xf32>
    %39 = vector.broadcast %38 : vector<1x128xf32> to vector<128x128xf32>
    %40 = arith.addf %37, %39 : vector<128x128xf32>
    %41 = vector.extract_strided_slice %34 {offsets = [0, 0], sizes = [128, 64], strides = [1, 1]} : vector<128x128xf32> to vector<128x64xf32>
    %42 = vector.shape_cast %41 : vector<128x64xf32> to vector<16x1x8x64xf32>
    %c0_19 = arith.constant 0 : index
    %c0_20 = arith.constant 0 : index
    %c0_21 = arith.constant 0 : index
    %c0_22 = arith.constant 0 : index
    %43 = vector.load %arg8[%c0_19, %c0_20, %c0_21, %c0_22] : memref<16x2x8x64xf32, #tpu.memory_space<vmem>>, vector<16x1x8x64xf32>
    tpu.vector_store %arg8[%c0_19, %c0_20, %c0_21, %c0_22], %42 {strides = array<i32>} : memref<16x2x8x64xf32, #tpu.memory_space<vmem>>, vector<16x1x8x64xf32>,
    %44 = vector.extract_strided_slice %34 {offsets = [0, 64], sizes = [128, 64], strides = [1, 1]} : vector<128x128xf32> to vector<128x64xf32>
    %45 = vector.shape_cast %44 : vector<128x64xf32> to vector<16x1x8x64xf32>
    %c0_23 = arith.constant 0 : index
    %c1 = arith.constant 1 : index
    %c0_24 = arith.constant 0 : index
    %c0_25 = arith.constant 0 : index
    %46 = vector.load %arg8[%c0_23, %c1, %c0_24, %c0_25] : memref<16x2x8x64xf32, #tpu.memory_space<vmem>>, vector<16x1x8x64xf32>
    tpu.vector_store %arg8[%c0_23, %c1, %c0_24, %c0_25], %45 {strides = array<i32>} : memref<16x2x8x64xf32, #tpu.memory_space<vmem>>, vector<16x1x8x64xf32>,
    %47 = vector.extract_strided_slice %40 {offsets = [0, 0], sizes = [128, 64], strides = [1, 1]} : vector<128x128xf32> to vector<128x64xf32>
    %48 = vector.shape_cast %47 : vector<128x64xf32> to vector<16x1x8x64xf32>
    %c0_26 = arith.constant 0 : index
    %c0_27 = arith.constant 0 : index
    %c0_28 = arith.constant 0 : index
    %c0_29 = arith.constant 0 : index
    %49 = vector.load %arg9[%c0_26, %c0_27, %c0_28, %c0_29] : memref<16x2x8x64xf32, #tpu.memory_space<vmem>>, vector<16x1x8x64xf32>
    tpu.vector_store %arg9[%c0_26, %c0_27, %c0_28, %c0_29], %48 {strides = array<i32>} : memref<16x2x8x64xf32, #tpu.memory_space<vmem>>, vector<16x1x8x64xf32>,
    %50 = vector.extract_strided_slice %40 {offsets = [0, 64], sizes = [128, 64], strides = [1, 1]} : vector<128x128xf32> to vector<128x64xf32>
    %51 = vector.shape_cast %50 : vector<128x64xf32> to vector<16x1x8x64xf32>
    %c0_30 = arith.constant 0 : index
    %c1_31 = arith.constant 1 : index
    %c0_32 = arith.constant 0 : index
    %c0_33 = arith.constant 0 : index
    %52 = vector.load %arg9[%c0_30, %c1_31, %c0_32, %c0_33] : memref<16x2x8x64xf32, #tpu.memory_space<vmem>>, vector<16x1x8x64xf32>
    tpu.vector_store %arg9[%c0_30, %c1_31, %c0_32, %c0_33], %51 {strides = array<i32>} : memref<16x2x8x64xf32, #tpu.memory_space<vmem>>, vector<16x1x8x64xf32>,
    return
  }
  func.func @transform_0(%arg0: i32) -> (i32, i32) {
    %c0_i32 = arith.constant 0 : i32
    %c0_i32_0 = arith.constant 0 : i32
    return %arg0, %c0_i32 : i32, i32
  }
  func.func @transform_1(%arg0: i32) -> (i32, i32) {
    %c0_i32 = arith.constant 0 : i32
    %c0_i32_0 = arith.constant 0 : i32
    return %arg0, %c0_i32 : i32, i32
  }
  func.func @transform_2(%arg0: i32) -> (i32, i32) {
    %c0_i32 = arith.constant 0 : i32
    %c0_i32_0 = arith.constant 0 : i32
    %c0_i32_1 = arith.constant 0 : i32
    return %c0_i32, %c0_i32_0 : i32, i32
  }
  func.func @transform_3(%arg0: i32) -> (i32, i32) {
    %c0_i32 = arith.constant 0 : i32
    %c0_i32_0 = arith.constant 0 : i32
    %c0_i32_1 = arith.constant 0 : i32
    return %c0_i32, %c0_i32_0 : i32, i32
  }
  func.func @transform_4(%arg0: i32) -> (i32, i32) {
    %c0_i32 = arith.constant 0 : i32
    %c0_i32_0 = arith.constant 0 : i32
    %c0_i32_1 = arith.constant 0 : i32
    return %c0_i32, %c0_i32_0 : i32, i32
  }
  func.func @transform_5(%arg0: i32) -> (i32, i32) {
    %c0_i32 = arith.constant 0 : i32
    %c0_i32_0 = arith.constant 0 : i32
    %c0_i32_1 = arith.constant 0 : i32
    return %c0_i32, %c0_i32_0 : i32, i32
  }
  func.func @transform_6(%arg0: i32) -> (i32, i32) {
    %c0_i32 = arith.constant 0 : i32
    %c0_i32_0 = arith.constant 0 : i32
    %c0_i32_1 = arith.constant 0 : i32
    return %c0_i32, %c0_i32_0 : i32, i32
  }
  func.func @transform_7(%arg0: i32) -> (i32, i32, i32, i32) {
    %c0_i32 = arith.constant 0 : i32
    %c0_i32_0 = arith.constant 0 : i32
    %c0_i32_1 = arith.constant 0 : i32
    %c0_i32_2 = arith.constant 0 : i32
    return %arg0, %c0_i32, %c0_i32_0, %c0_i32_1 : i32, i32, i32, i32
  }
  func.func @transform_8(%arg0: i32) -> (i32, i32, i32, i32) {
    %c0_i32 = arith.constant 0 : i32
    %c0_i32_0 = arith.constant 0 : i32
    %c0_i32_1 = arith.constant 0 : i32
    %c0_i32_2 = arith.constant 0 : i32
    return %arg0, %c0_i32, %c0_i32_0, %c0_i32_1 : i32, i32, i32, i32
  }
}

</mosaic_0001>

<bundles_post_ra>
// kernel: tile.14
= control target key start
LH: loop header
LB: loop body
LE: loop exit
PB: predicated region body
PF: predicated region fallthrough
CT: control target
= control target key end

     0   :  { %s37_s8 = smov 32   ;;  %s38_s9 = smov 64   ;;  %vm7_vm0 = vcmask 261120   ;;  %vm13_vm1 = vcmask 1048320   ;;  %vm19_vm2 = vcmask 785920   ;;  %vm25_vm3 = vcmask 523520   ;;  %s55_s0 = inlined_call_operand.vmem [shape: f32[4,32], index: 0, kind: input, shape index: {}]   ;;  %s56_s1 = inlined_call_operand.vmem [shape: f32[1,128], index: 1, kind: output, shape index: {}]  }
   0x1   :  { %v4_v0 = vld [vmem:[%s55_s0] sm:$0xf]  ;;  %s36_s0 = smov 96  }
   0x2   :  { %5 = vst [vmem:[#allocation1] sm:$0xf] %v4_v0 }
   0x9   :  { %v10_v1 = vld [vmem:[#allocation1 + $0x3] sm:$0x1]   ;;  %v22_v2 = vld [vmem:[#allocation1 + $0x1] sm:$0x1]   ;;  %v16_v3 = vld [vmem:[#allocation1 + $0x2] sm:$0x1]  }
   0xa   :  { %11 = vrot.lane.b32.xlu0 %v10_v1, %s36_s0  ;;  %23 = vrot.lane.b32.xlu1 %v22_v2, %s37_s8  ;;  %v6_v4 = vld [vmem:[#allocation1] sm:$0x1]  }
   0xb   :  { %8 = vst.msk [vmem:[#allocation0] sm:$0x1] %vm7_vm0, %v6_v4  }
  0x12   :  { %17 = vrot.lane.b32.xlu0 %v16_v3, %s38_s9 }
  0x7c   :  { %v12_v5 = vpop.permute.xlu0 %11   ;;  %v24_v6 = vpop.permute.xlu1 %23  }
  0x7d   :  { %14 = vst.msk [vmem:[#allocation0] sm:$0x1] %vm13_vm1, %v12_v5  }
  0x84   :  { %v18_v7 = vpop.permute.xlu0 %17  }
  0x85   :  { %20 = vst.msk [vmem:[#allocation0] sm:$0x1] %vm19_vm2, %v18_v7  }
  0x86   :  { %26 = vst.msk [vmem:[#allocation0] sm:$0x1] %vm25_vm3, %v24_v6  }
  0x8d   :  { %v29_v8 = vld [vmem:[#allocation0] sm:$0x1] }
  0x8e   :  { %32 = vst [vmem:[%s56_s1] sm:$0x1] %v29_v8 }

// kernel: tile.13
= control target key start
LH: loop header
LB: loop body
LE: loop exit
PB: predicated region body
PF: predicated region fallthrough
CT: control target
= control target key end

     0   :  { %s22_s0 = inlined_call_operand.vmem [shape: f32[32], index: 0, kind: input, shape index: {}]   ;;  %s23_s1 = inlined_call_operand.vmem [shape: f32[4,32], index: 1, kind: output, shape index: {}]  }
   0x1   :  { %v4_v0 = vld [vmem:[%s22_s0] ss:$0 sm:$0xff] }
   0x2   :  { %5 = vst [vmem:[%s23_s1] sm:$0xf] %v4_v0 }

// kernel: upsampling_block_forward.1
= control target key start
LH: loop header
LB: loop body
LE: loop exit
PB: predicated region body
PF: predicated region fallthrough
CT: control target
= control target key end

     0   :  { %v44_v0 = vlaneseq  ;;  %vm285_vm0 = vcmask 1046528   ;;  %vm391_vm2 = vcmask 261120   ;;  %s1057_s20 = smov 64   ;;  %s1769_s3 = inlined_call_operand.vmem [shape: f32[32,128], index: 3, kind: input, shape index: {}]   ;;  %s1770_s2 = inlined_call_operand.vmem [shape: f32[32,128], index: 2, kind: input, shape index: {}]   ;;  %s1771_s4 = inlined_call_operand.vmem [shape: f32[32,128], index: 4, kind: input, shape index: {}]   ;;  %s1772_s0 = inlined_call_operand.vmem [shape: f32[128,32], index: 0, kind: input, shape index: {}]   ;;  %s1773_s1 = inlined_call_operand.vmem [shape: f32[128,32], index: 1, kind: input, shape index: {}]   ;;  %s1774_s6 = inlined_call_operand.vmem [shape: f32[1,128], index: 6, kind: input, shape index: {}]   ;;  %s1775_s5 = inlined_call_operand.vmem [shape: f32[1,128], index: 5, kind: input, shape index: {}]   ;;  %s1776_s7 = inlined_call_operand.vmem [shape: f32[16,2,8,64], index: 7, kind: output, shape index: {0}]   ;;  %s1777_s8 = inlined_call_operand.vmem [shape: f32[16,2,8,64], index: 8, kind: output, shape index: {1}]  }
   0x1   :  { %v390_v1 = vld [vmem:[%s1769_s3 + $0x18] sm:$0xff]  ;;  %v389_v4 = vld [vmem:[%s1769_s3 + $0x10] sm:$0xff]  ;;  %v388_v8 = vld [vmem:[%s1769_s3 + $0x8] sm:$0xff] }
   0x2   :  { %v1109_v2 = vld [vmem:[%s1770_s2 + $0x18] sm:$0xff]  ;;  %452 = vmatpush.msra.mxu0 %v390_v1  ;;  %v1123_v5 = vld [vmem:[%s1770_s2 + $0x10] sm:$0xff]  ;;  %v1130_v7 = vshrl.u32 %v44_v0, 7  ;;  %1042 = vmatpush.msra.mxu3 %v390_v1  ;;  %v1139_v9 = vld [vmem:[%s1770_s2 + $0x8] sm:$0xff] }
   0x3   :  { %v1114_v3 = vld [vmem:[%s1771_s4 + $0x18] sm:$0xff]  ;;  %549 = vmatpush.msra.mxu1 %v1109_v2  ;;  %v1128_v6 = vld [vmem:[%s1771_s4 + $0x10] sm:$0xff]  ;;  %v1145_v10 = vld [vmem:[%s1771_s4 + $0x8] sm:$0xff] }
   0x4   :  { %706 = vmatpush.msra.mxu2 %v1114_v3  ;;  %453 = vmatpush.msra.mxu0 %v389_v4  ;;  %v387_v11 = vld [vmem:[%s1769_s3] sm:$0xff]  ;;  %v65_v13 = vand.u32 7, %v1130_v7  ;;  %v57_v14 = vadd.s32 96, %v1130_v7  ;;  %v46_v15 = vadd.s32 8, %v1130_v7  ;;  %v29_v18 = vld [vmem:[%s1772_s0 + $0x8] sm:$0xff]  ;;  %v58_v19 = vadd.s32 104, %v1130_v7 }
   0x5   :  { %550 = vmatpush.msra.mxu1 %v1123_v5  ;;  %v1153_v12 = vld [vmem:[%s1770_s2] sm:$0xff]  ;;  %1043 = vmatpush.msra.mxu3 %v389_v4  ;;  %v287_v22 = vrot.slane %v29_v18, 1  ;;  %v1187_v24 = vld [vmem:[%s1772_s0 + $0x68] sm:$0xff]  ;;  %v30_v28 = vld [vmem:[%s1772_s0 + $0x10] sm:$0xff]  ;;  %v47_v41 = vadd.s32 16, %v1130_v7  ;;  %v59_v45 = vadd.s32 112, %v1130_v7 }
   0x6   :  { %707 = vmatpush.msra.mxu2 %v1128_v6  ;;  %v1162_v16 = vld [vmem:[%s1771_s4] sm:$0xff]  ;;  %454 = vmatpush.msra.mxu0 %v388_v8  ;;  %vm1174_vm1 = vcmp.ne.s32.totalorder %v65_v13, 7  ;;  %v149_v25 = vand.u32 7, %v57_v14  ;;  %v311_v27 = vrot.slane %v1187_v24, 1  ;;  %v1198_v29 = vld [vmem:[%s1772_s0 + $0x70] sm:$0xff]  ;;  %v72_v32 = vand.u32 7, %v46_v15 }
   0x7   :  { %v1167_v17 = vld [vmem:[%s1772_s0] sm:$0xff]  ;;  %551 = vmatpush.msra.mxu1 %v1139_v9  ;;  %1044 = vmatpush.msra.mxu3 %v388_v8  ;;  %v289_v33 = vrot.slane %v30_v28, 1  ;;  %v156_v36 = vand.u32 7, %v58_v19  ;;  %v313_v37 = vrot.slane %v1198_v29, 1  ;;  %v31_v44 = vld [vmem:[%s1772_s0 + $0x18] sm:$0xff]  ;;  %v623_v48 = vld [vmem:[%s1773_s1 + $0x8] sm:$0xff] }
   0x8   :  { %v286_v21 = vrot.slane %v1167_v17, 1  ;;  %v1182_v23 = vld [vmem:[%s1772_s0 + $0x60] sm:$0xff]  ;;  %708 = vmatpush.msra.mxu2 %v1145_v10  ;;  %455 = vmatpush.msra.mxu0 %v387_v11  ;;  %vm265_vm3 = vcmp.ne.s32.totalorder %v149_v25, 7  ;;  %vm1220_vm4 = vcmp.ne.s32.totalorder %v72_v32, 7  ;;  %v1239_v46 = vld [vmem:[%s1772_s0 + $0x78] sm:$0xff]  ;;  %v79_v50 = vand.u32 7, %v47_v41 }
   0x9   :  { %v309_v26 = vrot.slane %v1182_v23, 1  ;;  %552 = vmatpush.msra.mxu1 %v1153_v12  ;;  %v622_v31 = vld [vmem:[%s1773_s1] sm:$0xff]  ;;  %1045 = vmatpush.msra.mxu3 %v387_v11  ;;  %v290_v40 = vsel %vm285_vm0, %v287_v22, %v289_v33  ;;  %vm1226_vm5 = vcmp.ne.s32.totalorder %v156_v36, 7  ;;  %v314_v43 = vsel %vm285_vm0, %v311_v27, %v313_v37  ;;  %v624_v62 = vld [vmem:[%s1773_s1 + $0x10] sm:$0xff]  ;;  %v35_v32 = vld [vmem:[%s1772_s0 + $0x38] sm:$0xff] }
   0xa   :  { %v288_v30 = vsel %vm285_vm0, %v286_v21, %v287_v22  ;;  %709 = vmatpush.msra.mxu2 %v1162_v16  ;;  %978 = vmatmul.msk.f32.vlgmr.msra.gmra.mxu1 %vm391_vm2, %v1167_v17  ;;  %v368_v47 = vsel %vm1220_vm4, %v290_v40, 0.0  ;;  %v380_v49 = vsel %vm1226_vm5, %v314_v43, 0.0  ;;  %v291_v51 = vrot.slane %v31_v44, 1  ;;  %v32_v59 = vld [vmem:[%s1772_s0 + $0x20] sm:$0xff]  ;;  %v34_v15 = vld [vmem:[%s1772_s0 + $0x30] sm:$0xff]  ;;  %v1319_v22 = vld [vmem:[%s1772_s0 + $0x48] sm:$0xff] }
   0xb   :  { %v367_v34 = vsel %vm1174_vm1, %v288_v30, 0.0  ;;  %v312_v35 = vsel %vm285_vm0, %v309_v26, %v311_v27  ;;  %994 = vmatmul.msk.f32.vlgmr.msra.gmra.mxu2 %vm391_vm2, %v622_v31  ;;  %1046 = vmatpush.msrb.mxu3 %v1109_v2  ;;  %v163_v52 = vand.u32 7, %v59_v45  ;;  %v315_v53 = vrot.slane %v1239_v46, 1  ;;  %v626_v17 = vld [vmem:[%s1773_s1 + $0x20] sm:$0xff]  ;;  %v38_v41 = vld [vmem:[%s1772_s0 + $0x50] sm:$0xff] }
   0xc   :  { %962 = vmatmul.msk.f32.vlgmr.msra.gmra.mxu0 %vm391_vm2, %v367_v34  ;;  %v379_v38 = vsel %vm265_vm3, %v312_v35, 0.0  ;;  %vm1254_vm6 = vcmp.ne.s32.totalorder %v79_v50, 7  ;;  %v292_v55 = vsel %vm285_vm0, %v289_v33, %v291_v51  ;;  %v48_v56 = vadd.s32 24, %v1130_v7  ;;  %v1311_v20 = vld [vmem:[%s1772_s0 + $0x40] sm:$0xff] }
   0xd   :  { %974 = vmatmul.msk.f32.vlgmr.msra.gmra.mxu3 %vm391_vm2, %v379_v38  ;;  %vm1261_vm7 = vcmp.ne.s32.totalorder %v163_v52, 7  ;;  %v316_v58 = vsel %vm285_vm0, %v313_v37, %v315_v53  ;;  %v60_v60 = vadd.s32 120, %v1130_v7  ;;  %v369_v61 = vsel %vm1254_vm6, %v292_v55, 0.0  ;;  %v627_v37 = vld [vmem:[%s1773_s1 + $0x28] sm:$0xff] }
   0xe   :  { %1047 = vmatpush.msrb.mxu3 %v1123_v5  ;;  %v381_v63 = vsel %vm1261_vm7, %v316_v58, 0.0  ;;  %v86_v0 = vand.u32 7, %v48_v56  ;;  %v293_v1 = vrot.slane %v32_v59, 1  ;;  %v49_v4 = vadd.s32 32, %v1130_v7 }
   0xf   :  { %v170_v2 = vand.u32 7, %v60_v60  ;;  %v334_v5 = vsel %vm285_vm0, %v315_v53, %v286_v21  ;;  %v50_v14 = vadd.s32 40, %v1130_v7  ;;  %v297_v19 = vrot.slane %v34_v15, 1  ;;  %v39_v53 = vld [vmem:[%s1772_s0 + $0x58] sm:$0xff] }
  0x10   :  { %1048 = vmatpush.msrb.mxu3 %v1139_v9  ;;  %vm256_vm8 = vcmp.ne.s32.totalorder %v86_v0, 7  ;;  %v625_v9 = vld [vmem:[%s1773_s1 + $0x18] sm:$0xff]  ;;  %v93_v11 = vand.u32 7, %v49_v4  ;;  %v53_v21 = vadd.s32 64, %v1130_v7  ;;  %v301_v25 = vrot.slane %v1311_v20, 1 }
  0x11   :  { %vm268_vm9 = vcmp.ne.s32.totalorder %v170_v2, 7  ;;  %v51_v31 = vadd.s32 48, %v1130_v7  ;;  %v299_v39 = vrot.slane %v35_v32, 1  ;;  %v54_v40 = vadd.s32 72, %v1130_v7  ;;  %v632_v2 = vld [vmem:[%s1773_s1 + $0x50] sm:$0xff]  ;;  %v633_v4 = vld [vmem:[%s1773_s1 + $0x58] sm:$0xff] }
  0x12   :  { %979 = vmatmul.msk.f32.gmra.mxu1 %vm391_vm2, %v29_v18  ;;  %1049 = vmatpush.msrb.mxu3 %v1153_v12  ;;  %vm257_vm10 = vcmp.ne.s32.totalorder %v93_v11, 7  ;;  %v100_v18 = vand.u32 7, %v50_v14  ;;  %v121_v27 = vand.u32 7, %v53_v21  ;;  %v305_v43 = vrot.slane %v38_v41, 1 }
  0x13   :  { %995 = vmatmul.msk.f32.gmra.mxu2 %vm391_vm2, %v623_v48  ;;  %v107_v38 = vand.u32 7, %v51_v31  ;;  %v128_v42 = vand.u32 7, %v54_v40  ;;  %v52_v45 = vadd.s32 56, %v1130_v7  ;;  %v55_v52 = vadd.s32 80, %v1130_v7 }
  0x14   :  { %963 = vmatmul.msk.f32.gmra.mxu0 %vm391_vm2, %v368_v47  ;;  %1050 = vmatpush.msra.mxu3 %v1114_v3  ;;  %v294_v3 = vsel %vm285_vm0, %v291_v51, %v293_v1  ;;  %vm258_vm11 = vcmp.ne.s32.totalorder %v100_v18, 7  ;;  %vm1331_vm12 = vcmp.ne.s32.totalorder %v121_v27, 7  ;;  %v307_v55 = vrot.slane %v39_v53, 1 }
  0x15   :  { %975 = vmatmul.msk.f32.gmra.mxu3 %vm391_vm2, %v380_v49  ;;  %v370_v8 = vsel %vm256_vm8, %v294_v3, 0.0  ;;  %vm259_vm13 = vcmp.ne.s32.totalorder %v107_v38, 7  ;;  %vm1352_vm14 = vcmp.ne.s32.totalorder %v128_v42, 7  ;;  %v114_v51 = vand.u32 7, %v52_v45  ;;  %v636_v3 = vld [vmem:[%s1773_s1 + $0x70] sm:$0xff] }
  0x16   :  { %1051 = vmatpush.msra.mxu3 %v1128_v6  ;;  %v33_v6 = vld [vmem:[%s1772_s0 + $0x28] sm:$0xff]  ;;  %v135_v54 = vand.u32 7, %v55_v52  ;;  %v302_v56 = vsel %vm285_vm0, %v299_v39, %v301_v25  ;;  %v308_v58 = vsel %vm285_vm0, %v305_v43, %v307_v55 }
  0x17   :  { %v295_v12 = vrot.slane %v33_v6, 1  ;;  %vm260_vm15 = vcmp.ne.s32.totalorder %v114_v51, 7 }
  0x18   :  { %1052 = vmatpush.msra.mxu3 %v1145_v10  ;;  %v382_v10 = vsel %vm268_vm9, %v334_v5, 0.0  ;;  %vm1372_vm1 = vcmp.ne.s32.totalorder %v135_v54, 7  ;;  %v374_v60 = vsel %vm260_vm15, %v302_v56, 0.0  ;;  %v637_v5 = vld [vmem:[%s1773_s1 + $0x78] sm:$0xff] }
  0x19   :  { %v296_v13 = vsel %vm285_vm0, %v293_v1, %v295_v12  ;;  %v298_v30 = vsel %vm285_vm0, %v295_v12, %v297_v19  ;;  %v630_v1 = vld [vmem:[%s1773_s1 + $0x40] sm:$0xff] }
  0x1a   :  { %980 = vmatmul.msk.f32.gmra.mxu1 %vm391_vm2, %v30_v28  ;;  %1053 = vmatpush.msra.mxu3 %v1162_v16  ;;  %v371_v16 = vsel %vm257_vm10, %v296_v13, 0.0  ;;  %v303_v28 = vrot.slane %v1319_v22, 1  ;;  %v372_v36 = vsel %vm258_vm11, %v298_v30, 0.0  ;;  %v1448_v12 = vld [vmem:[%s1774_s6] ss:$0 sm:$0xff] }
  0x1b   :  { %996 = vmatmul.msk.f32.gmra.mxu2 %vm391_vm2, %v624_v62 }
  0x1c   :  { %964 = vmatmul.msk.f32.gmra.mxu0 %vm391_vm2, %v369_v61  ;;  %v304_v34 = vsel %vm285_vm0, %v301_v25, %v303_v28  ;;  %v306_v48 = vsel %vm285_vm0, %v303_v28, %v305_v43  ;;  %v629_v61 = vld [vmem:[%s1773_s1 + $0x38] sm:$0xff] }
  0x1d   :  { %976 = vmatmul.msk.f32.gmra.mxu3 %vm391_vm2, %v381_v63  ;;  %v375_v35 = vsel %vm1331_vm12, %v304_v34, 0.0  ;;  %v376_v49 = vsel %vm1352_vm14, %v306_v48, 0.0  ;;  %v310_v63 = vsel %vm285_vm0, %v307_v55, %v309_v26  ;;  %v635_v26 = vld [vmem:[%s1773_s1 + $0x68] sm:$0xff] }
  0x22   :  { %981 = vmatmul.msk.f32.gmra.mxu1 %vm391_vm2, %v31_v44  ;;  %v300_v44 = vsel %vm285_vm0, %v297_v19, %v299_v39  ;;  %vm759_vm0 = vcmask 523264  }
  0x23   :  { %997 = vmatmul.msk.f32.gmra.mxu2 %vm391_vm2, %v625_v9  ;;  %v373_v50 = vsel %vm259_vm13, %v300_v44, 0.0 }
  0x24   :  { %965 = vmatmul.msk.f32.gmra.mxu0 %vm391_vm2, %v370_v8 }
  0x25   :  { %977 = vmatmul.msk.f32.gmra.mxu3 %vm391_vm2, %v382_v10 }
  0x2a   :  { %982 = vmatmul.msk.f32.gmra.mxu1 %vm391_vm2, %v32_v59  ;;  %v377_v59 = vsel %vm1372_vm1, %v308_v58, 0.0 }
  0x2b   :  { %998 = vmatmul.msk.f32.gmra.mxu2 %vm391_vm2, %v626_v17 }
  0x2c   :  { %966 = vmatmul.msk.f32.gmra.mxu0 %vm391_vm2, %v371_v16 }
  0x2d   :  { %990 = vmatmul.msk.f32.vlgmr.msrb.gmra.mxu3 %vm391_vm2, %v1182_v23  ;;  %v631_v23 = vld [vmem:[%s1773_s1 + $0x48] sm:$0xff] }
  0x32   :  { %983 = vmatmul.msk.f32.gmra.mxu1 %vm391_vm2, %v33_v6  ;;  %v1442_v6 = vld [vmem:[%s1775_s5] ss:$0 sm:$0xff] }
  0x33   :  { %999 = vmatmul.msk.f32.gmra.mxu2 %vm391_vm2, %v627_v37 }
  0x34   :  { %967 = vmatmul.msk.f32.gmra.mxu0 %vm391_vm2, %v372_v36 }
  0x35   :  { %991 = vmatmul.msk.f32.gmra.mxu3 %vm391_vm2, %v1187_v24  ;;  %v628_v24 = vld [vmem:[%s1773_s1 + $0x30] sm:$0xff] }
  0x3a   :  { %984 = vmatmul.msk.f32.gmra.mxu1 %vm391_vm2, %v34_v15 }
  0x3b   :  { %1000 = vmatmul.msk.f32.gmra.mxu2 %vm391_vm2, %v628_v24 }
  0x3c   :  { %968 = vmatmul.msk.f32.gmra.mxu0 %vm391_vm2, %v373_v50 }
  0x3d   :  { %992 = vmatmul.msk.f32.gmra.mxu3 %vm391_vm2, %v1198_v29  ;;  %v56_v29 = vadd.s32 88, %v1130_v7 }
  0x3f   :  { %v142_v62 = vand.u32 7, %v56_v29 }
  0x41   :  { %vm1391_vm3 = vcmp.ne.s32.totalorder %v142_v62, 7 }
  0x42   :  { %985 = vmatmul.msk.f32.gmra.mxu1 %vm391_vm2, %v35_v32  ;;  %v378_v7 = vsel %vm1391_vm3, %v310_v63, 0.0 }
  0x43   :  { %1001 = vmatmul.msk.f32.gmra.mxu2 %vm391_vm2, %v629_v61 }
  0x44   :  { %969 = vmatmul.msk.f32.gmra.mxu0 %vm391_vm2, %v374_v60 }
  0x45   :  { %993 = vmatmul.msk.f32.gmra.mxu3 %vm391_vm2, %v1239_v46  ;;  %v634_v46 = vld [vmem:[%s1773_s1 + $0x60] sm:$0xff] }
  0x4a   :  { %986 = vmatmul.msk.f32.gmra.mxu1 %vm391_vm2, %v1311_v20 }
  0x4b   :  { %1002 = vmatmul.msk.f32.gmra.mxu2 %vm391_vm2, %v630_v1 }
  0x4c   :  { %970 = vmatmul.msk.f32.gmra.mxu0 %vm391_vm2, %v375_v35 }
  0x4d   :  { %1006 = vmatmul.msk.f32.vlgmr.msra.gmra.mxu3 %vm391_vm2, %v634_v46 }
  0x52   :  { %987 = vmatmul.msk.f32.gmra.mxu1 %vm391_vm2, %v1319_v22 }
  0x53   :  { %1003 = vmatmul.msk.f32.gmra.mxu2 %vm391_vm2, %v631_v23 }
  0x54   :  { %971 = vmatmul.msk.f32.gmra.mxu0 %vm391_vm2, %v376_v49 }
  0x55   :  { %1007 = vmatmul.msk.f32.gmra.mxu3 %vm391_vm2, %v635_v26 }
  0x5a   :  { %988 = vmatmul.msk.f32.gmra.mxu1 %vm391_vm2, %v38_v41 }
  0x5b   :  { %1004 = vmatmul.msk.f32.gmra.mxu2 %vm391_vm2, %v632_v2 }
  0x5c   :  { %972 = vmatmul.msk.f32.gmra.mxu0 %vm391_vm2, %v377_v59 }
  0x5d   :  { %1008 = vmatmul.msk.f32.gmra.mxu3 %vm391_vm2, %v636_v3 }
  0x62   :  { %989 = vmatmul.msk.f32.gmra.mxu1 %vm391_vm2, %v39_v53 }
  0x63   :  { %1005 = vmatmul.msk.f32.gmra.mxu2 %vm391_vm2, %v633_v4 }
  0x64   :  { %973 = vmatmul.msk.f32.gmra.mxu0 %vm391_vm2, %v378_v7 }
  0x65   :  { %1009 = vmatmul.msk.f32.gmra.mxu3 %vm391_vm2, %v637_v5 }
  0x87   :  { %v554_v9 = vpop.f32.mrf.mxu1 }
  0x89   :  { %v457_v8 = vpop.f32.mrf.mxu0 }
  0x8a   :  { %v555_v10 = vadd.f32 %v554_v9, %v457_v8 }
  0x8c   :  { %v606_v11 = vadd.f32 %v1442_v6, %v555_v10 }
  0x8e   :  { %792 = vrot.lane.b32.xlu0 %v606_v11, %s1057_s20  ;;  %760 = vst.msk [vmem:[%s1776_s7] sm:$0xff] %vm759_vm0, %v606_v11  ;;  %v711_v13 = vpop.f32.mrf.mxu2 }
  0x8f   :  { %v712_v15 = vadd.f32 %v1448_v12, %v711_v13  ;;  %v557_v17 = vpop.f32.mrf.mxu1 }
  0x90   :  { %v493_v14 = vpop.f32.mrf.mxu3 }
  0x91   :  { %v460_v16 = vpop.f32.mrf.mxu0  ;;  %857 = vst.msk [vmem:[%s1777_s8] sm:$0xff] %vm759_vm0, %v712_v15  ;;  %889 = vrot.lane.b32.xlu1 %v712_v15, %s1057_s20 }
  0x92   :  { %v558_v18 = vadd.f32 %v557_v17, %v460_v16 }
  0x94   :  { %v607_v19 = vadd.f32 %v1442_v6, %v558_v18 }
  0x96   :  { %761 = vst.msk [vmem:[%s1776_s7 + $0x10] sm:$0xff] %vm759_vm0, %v607_v19  ;;  %794 = vrot.lane.b32.xlu0 %v607_v19, %s1057_s20  ;;  %v714_v20 = vpop.f32.mrf.mxu2 }
  0x97   :  { %v715_v22 = vadd.f32 %v1448_v12, %v714_v20  ;;  %v560_v27 = vpop.f32.mrf.mxu1 }
  0x98   :  { %v496_v21 = vpop.f32.mrf.mxu3 }
  0x99   :  { %v463_v25 = vpop.f32.mrf.mxu0  ;;  %858 = vst.msk [vmem:[%s1777_s8 + $0x10] sm:$0xff] %vm759_vm0, %v715_v22  ;;  %891 = vrot.lane.b32.xlu2 %v715_v22, %s1057_s20 }
  0x9a   :  { %v561_v28 = vadd.f32 %v560_v27, %v463_v25 }
  0x9c   :  { %v608_v30 = vadd.f32 %v1442_v6, %v561_v28 }
  0x9e   :  { %762 = vst.msk [vmem:[%s1776_s7 + $0x20] sm:$0xff] %vm759_vm0, %v608_v30  ;;  %796 = vrot.lane.b32.xlu1 %v608_v30, %s1057_s20  ;;  %v717_v31 = vpop.f32.mrf.mxu2 }
  0x9f   :  { %v718_v33 = vadd.f32 %v1448_v12, %v717_v31  ;;  %v563_v35 = vpop.f32.mrf.mxu1 }
  0xa0   :  { %v499_v32 = vpop.f32.mrf.mxu3 }
  0xa1   :  { %v466_v34 = vpop.f32.mrf.mxu0  ;;  %859 = vst.msk [vmem:[%s1777_s8 + $0x20] sm:$0xff] %vm759_vm0, %v718_v33  ;;  %893 = vrot.lane.b32.xlu0 %v718_v33, %s1057_s20 }
  0xa2   :  { %v564_v36 = vadd.f32 %v563_v35, %v466_v34 }
  0xa4   :  { %v609_v37 = vadd.f32 %v1442_v6, %v564_v36 }
  0xa6   :  { %763 = vst.msk [vmem:[%s1776_s7 + $0x30] sm:$0xff] %vm759_vm0, %v609_v37  ;;  %798 = vrot.lane.b32.xlu1 %v609_v37, %s1057_s20  ;;  %v720_v38 = vpop.f32.mrf.mxu2 }
  0xa7   :  { %v721_v40 = vadd.f32 %v1448_v12, %v720_v38  ;;  %v566_v42 = vpop.f32.mrf.mxu1 }
  0xa8   :  { %v502_v39 = vpop.f32.mrf.mxu3 }
  0xa9   :  { %v469_v41 = vpop.f32.mrf.mxu0  ;;  %860 = vst.msk [vmem:[%s1777_s8 + $0x30] sm:$0xff] %vm759_vm0, %v721_v40 }
  0xaa   :  { %v567_v43 = vadd.f32 %v566_v42, %v469_v41 }
  0xac   :  { %v610_v44 = vadd.f32 %v1442_v6, %v567_v43 }
  0xae   :  { %764 = vst.msk [vmem:[%s1776_s7 + $0x40] sm:$0xff] %vm759_vm0, %v610_v44  ;;  %895 = vrot.lane.b32.xlu1 %v721_v40, %s1057_s20  ;;  %800 = vrot.lane.b32.xlu2 %v610_v44, %s1057_s20  ;;  %v723_v45 = vpop.f32.mrf.mxu2 }
  0xaf   :  { %v724_v48 = vadd.f32 %v1448_v12, %v723_v45  ;;  %v569_v50 = vpop.f32.mrf.mxu1 }
  0xb0   :  { %v590_v47 = vpop.f32.mrf.mxu3 }
  0xb1   :  { %v591_v49 = vadd.f32 %v590_v47, %v493_v14  ;;  %v472_v24 = vpop.f32.mrf.mxu0  ;;  %861 = vst.msk [vmem:[%s1777_s8 + $0x40] sm:$0xff] %vm759_vm0, %v724_v48 }
  0xb2   :  { %v570_v51 = vadd.f32 %v569_v50, %v472_v24 }
  0xb3   :  { %v618_v52 = vadd.f32 %v1442_v6, %v591_v49 }
  0xb4   :  { %v611_v53 = vadd.f32 %v1442_v6, %v570_v51 }
  0xb5   :  { %772 = vst.msk [vmem:[%s1776_s7 + $0xc0] sm:$0xff] %vm759_vm0, %v618_v52  ;;  %816 = vrot.lane.b32.xlu0 %v618_v52, %s1057_s20 }
  0xb6   :  { %765 = vst.msk [vmem:[%s1776_s7 + $0x50] sm:$0xff] %vm759_vm0, %v611_v53  ;;  %897 = vrot.lane.b32.xlu2 %v724_v48, %s1057_s20  ;;  %v726_v54 = vpop.f32.mrf.mxu2 }
  0xb7   :  { %v727_v56 = vadd.f32 %v1448_v12, %v726_v54  ;;  %v572_v58 = vpop.f32.mrf.mxu1 }
  0xb8   :  { %v593_v55 = vpop.f32.mrf.mxu3 }
  0xb9   :  { %v594_v57 = vadd.f32 %v593_v55, %v496_v21  ;;  %v475_v59 = vpop.f32.mrf.mxu0  ;;  %862 = vst.msk [vmem:[%s1777_s8 + $0x50] sm:$0xff] %vm759_vm0, %v727_v56 }
  0xba   :  { %v573_v60 = vadd.f32 %v572_v58, %v475_v59 }
  0xbb   :  { %v619_v61 = vadd.f32 %v1442_v6, %v594_v57 }
  0xbc   :  { %v612_v29 = vadd.f32 %v1442_v6, %v573_v60 }
  0xbd   :  { %773 = vst.msk [vmem:[%s1776_s7 + $0xd0] sm:$0xff] %vm759_vm0, %v619_v61  ;;  %899 = vrot.lane.b32.xlu0 %v727_v56, %s1057_s20  ;;  %818 = vrot.lane.b32.xlu1 %v619_v61, %s1057_s20 }
  0xbe   :  { %766 = vst.msk [vmem:[%s1776_s7 + $0x60] sm:$0xff] %vm759_vm0, %v612_v29  ;;  %802 = vrot.lane.b32.xlu2 %v611_v53, %s1057_s20  ;;  %v729_v62 = vpop.f32.mrf.mxu2 }
  0xbf   :  { %v730_v0 = vadd.f32 %v1448_v12, %v729_v62  ;;  %v575_v1 = vpop.f32.mrf.mxu1 }
  0xc0   :  { %v596_v63 = vpop.f32.mrf.mxu3 }
  0xc1   :  { %v597_v7 = vadd.f32 %v596_v63, %v499_v32  ;;  %v478_v46 = vpop.f32.mrf.mxu0  ;;  %863 = vst.msk [vmem:[%s1777_s8 + $0x60] sm:$0xff] %vm759_vm0, %v730_v0 }
  0xc2   :  { %v576_v23 = vadd.f32 %v575_v1, %v478_v46 }
  0xc3   :  { %v620_v26 = vadd.f32 %v1442_v6, %v597_v7 }
  0xc4   :  { %v613_v2 = vadd.f32 %v1442_v6, %v576_v23 }
  0xc5   :  { %774 = vst.msk [vmem:[%s1776_s7 + $0xe0] sm:$0xff] %vm759_vm0, %v620_v26  ;;  %901 = vrot.lane.b32.xlu1 %v730_v0, %s1057_s20  ;;  %804 = vrot.lane.b32.xlu0 %v612_v29, %s1057_s20 }
  0xc6   :  { %767 = vst.msk [vmem:[%s1776_s7 + $0x70] sm:$0xff] %vm759_vm0, %v613_v2  ;;  %820 = vrot.lane.b32.xlu2 %v620_v26, %s1057_s20  ;;  %v732_v3 = vpop.f32.mrf.mxu2 }
  0xc7   :  { %v733_v5 = vadd.f32 %v1448_v12, %v732_v3  ;;  %v578_v9 = vpop.f32.mrf.mxu1 }
  0xc8   :  { %v599_v4 = vpop.f32.mrf.mxu3 }
  0xc9   :  { %v600_v8 = vadd.f32 %v599_v4, %v502_v39  ;;  %v481_v10 = vpop.f32.mrf.mxu0  ;;  %864 = vst.msk [vmem:[%s1777_s8 + $0x70] sm:$0xff] %vm759_vm0, %v733_v5 }
  0xca   :  { %v579_v11 = vadd.f32 %v578_v9, %v481_v10 }
  0xcb   :  { %v621_v13 = vadd.f32 %v1442_v6, %v600_v8 }
  0xcc   :  { %v614_v14 = vadd.f32 %v1442_v6, %v579_v11 }
  0xcd   :  { %775 = vst.msk [vmem:[%s1776_s7 + $0xf0] sm:$0xff] %vm759_vm0, %v621_v13  ;;  %822 = vrot.lane.b32.xlu0 %v621_v13, %s1057_s20  ;;  %806 = vrot.lane.b32.xlu1 %v613_v2, %s1057_s20 }
  0xce   :  { %768 = vst.msk [vmem:[%s1776_s7 + $0x80] sm:$0xff] %vm759_vm0, %v614_v14  ;;  %903 = vrot.lane.b32.xlu2 %v733_v5, %s1057_s20  ;;  %v735_v15 = vpop.f32.mrf.mxu2 }
  0xcf   :  { %v736_v17 = vadd.f32 %v1448_v12, %v735_v15  ;;  %v581_v19 = vpop.f32.mrf.mxu1 }
  0xd0   :  { %v747_v16 = vpop.f32.mrf.mxu3 }
  0xd1   :  { %v748_v18 = vadd.f32 %v1448_v12, %v747_v16  ;;  %v484_v20 = vpop.f32.mrf.mxu0  ;;  %865 = vst.msk [vmem:[%s1777_s8 + $0x80] sm:$0xff] %vm759_vm0, %v736_v17 }
  0xd2   :  { %v582_v21 = vadd.f32 %v581_v19, %v484_v20 }
  0xd3   :  { %869 = vst.msk [vmem:[%s1777_s8 + $0xc0] sm:$0xff] %vm759_vm0, %v748_v18 }
  0xd4   :  { %v615_v22 = vadd.f32 %v1442_v6, %v582_v21 }
  0xd5   :  { %905 = vrot.lane.b32.xlu0 %v736_v17, %s1057_s20  ;;  %913 = vrot.lane.b32.xlu1 %v748_v18, %s1057_s20 }
  0xd6   :  { %769 = vst.msk [vmem:[%s1776_s7 + $0x90] sm:$0xff] %vm759_vm0, %v615_v22  ;;  %808 = vrot.lane.b32.xlu2 %v614_v14, %s1057_s20  ;;  %v738_v25 = vpop.f32.mrf.mxu2 }
  0xd7   :  { %v739_v28 = vadd.f32 %v1448_v12, %v738_v25  ;;  %v584_v30 = vpop.f32.mrf.mxu1 }
  0xd8   :  { %v750_v27 = vpop.f32.mrf.mxu3 }
  0xd9   :  { %v487_v31 = vpop.f32.mrf.mxu0  ;;  %v751_v32 = vadd.f32 %v1448_v12, %v750_v27  ;;  %866 = vst.msk [vmem:[%s1777_s8 + $0x90] sm:$0xff] %vm759_vm0, %v739_v28 }
  0xda   :  { %v585_v33 = vadd.f32 %v584_v30, %v487_v31 }
  0xdb   :  { %870 = vst.msk [vmem:[%s1777_s8 + $0xd0] sm:$0xff] %vm759_vm0, %v751_v32 }
  0xdc   :  { %v616_v34 = vadd.f32 %v1442_v6, %v585_v33 }
  0xdd   :  { %907 = vrot.lane.b32.xlu1 %v739_v28, %s1057_s20  ;;  %810 = vrot.lane.b32.xlu0 %v615_v22, %s1057_s20 }
  0xde   :  { %770 = vst.msk [vmem:[%s1776_s7 + $0xa0] sm:$0xff] %vm759_vm0, %v616_v34  ;;  %v741_v35 = vpop.f32.mrf.mxu2 }
  0xdf   :  { %v742_v37 = vadd.f32 %v1448_v12, %v741_v35  ;;  %v587_v39 = vpop.f32.mrf.mxu1 }
  0xe0   :  { %v753_v36 = vpop.f32.mrf.mxu3 }
  0xe1   :  { %v490_v38 = vpop.f32.mrf.mxu0  ;;  %v754_v40 = vadd.f32 %v1448_v12, %v753_v36  ;;  %867 = vst.msk [vmem:[%s1777_s8 + $0xa0] sm:$0xff] %vm759_vm0, %v742_v37  ;;  %909 = vrot.lane.b32.xlu2 %v742_v37, %s1057_s20 }
  0xe2   :  { %v588_v41 = vadd.f32 %v587_v39, %v490_v38 }
  0xe3   :  { %871 = vst.msk [vmem:[%s1777_s8 + $0xe0] sm:$0xff] %vm759_vm0, %v754_v40 }
  0xe4   :  { %v617_v42 = vadd.f32 %v1442_v6, %v588_v41 }
  0xe5   :  { %812 = vrot.lane.b32.xlu1 %v616_v34, %s1057_s20 }
  0xe6   :  { %771 = vst.msk [vmem:[%s1776_s7 + $0xb0] sm:$0xff] %vm759_vm0, %v617_v42  ;;  %v744_v43 = vpop.f32.mrf.mxu2 }
  0xe7   :  { %v745_v45 = vadd.f32 %v1448_v12, %v744_v43 }
  0xe8   :  { %v756_v44 = vpop.f32.mrf.mxu3 }
  0xe9   :  { %v757_v47 = vadd.f32 %v1448_v12, %v756_v44  ;;  %868 = vst.msk [vmem:[%s1777_s8 + $0xb0] sm:$0xff] %vm759_vm0, %v745_v45  ;;  %911 = vrot.lane.b32.xlu0 %v745_v45, %s1057_s20  ;;  %814 = vrot.lane.b32.xlu2 %v617_v42, %s1057_s20 }
  0xeb   :  { %872 = vst.msk [vmem:[%s1777_s8 + $0xf0] sm:$0xff] %vm759_vm0, %v757_v47 }
  0xed   :  { %919 = vrot.lane.b32.xlu1 %v757_v47, %s1057_s20 }
  0xf1   :  { %917 = vrot.lane.b32.xlu0 %v754_v40, %s1057_s20  ;;  %915 = vrot.lane.b32.xlu2 %v751_v32, %s1057_s20 }
  0xf3   :  { %v892_v6 = vpop.permute.xlu2 %891 }
  0xf4   :  { %1027 = vst.msk [vmem:[%s1777_s8 + $0x18] sm:$0xff] %vm759_vm0, %v892_v6 }
 0x100   :  { %v793_v12 = vpop.permute.xlu0 %792 }
 0x101   :  { %1010 = vst.msk [vmem:[%s1776_s7 + $0x8] sm:$0xff] %vm759_vm0, %v793_v12 }
 0x103   :  { %v890_v48 = vpop.permute.xlu1 %889 }
 0x104   :  { %1026 = vst.msk [vmem:[%s1777_s8 + $0x8] sm:$0xff] %vm759_vm0, %v890_v48 }
 0x108   :  { %v801_v49 = vpop.permute.xlu2 %800  ;;  %v795_v50 = vpop.permute.xlu0 %794 }
 0x109   :  { %1014 = vst.msk [vmem:[%s1776_s7 + $0x48] sm:$0xff] %vm759_vm0, %v801_v49 }
 0x10a   :  { %1011 = vst.msk [vmem:[%s1776_s7 + $0x18] sm:$0xff] %vm759_vm0, %v795_v50 }
 0x110   :  { %v797_v24 = vpop.permute.xlu1 %796  ;;  %v898_v51 = vpop.permute.xlu2 %897 }
 0x111   :  { %1012 = vst.msk [vmem:[%s1776_s7 + $0x28] sm:$0xff] %vm759_vm0, %v797_v24 }
 0x112   :  { %1030 = vst.msk [vmem:[%s1777_s8 + $0x48] sm:$0xff] %vm759_vm0, %v898_v51 }
 0x113   :  { %v894_v52 = vpop.permute.xlu0 %893 }
 0x114   :  { %1028 = vst.msk [vmem:[%s1777_s8 + $0x28] sm:$0xff] %vm759_vm0, %v894_v52 }
 0x118   :  { %v799_v53 = vpop.permute.xlu1 %798  ;;  %v803_v54 = vpop.permute.xlu2 %802 }
 0x119   :  { %1013 = vst.msk [vmem:[%s1776_s7 + $0x38] sm:$0xff] %vm759_vm0, %v799_v53 }
 0x11a   :  { %1015 = vst.msk [vmem:[%s1776_s7 + $0x58] sm:$0xff] %vm759_vm0, %v803_v54 }
 0x120   :  { %v896_v55 = vpop.permute.xlu1 %895  ;;  %v821_v56 = vpop.permute.xlu2 %820 }
 0x121   :  { %1029 = vst.msk [vmem:[%s1777_s8 + $0x38] sm:$0xff] %vm759_vm0, %v896_v55 }
 0x122   :  { %1024 = vst.msk [vmem:[%s1776_s7 + $0xe8] sm:$0xff] %vm759_vm0, %v821_v56 }
 0x127   :  { %v817_v57 = vpop.permute.xlu0 %816 }
 0x128   :  { %1022 = vst.msk [vmem:[%s1776_s7 + $0xc8] sm:$0xff] %vm759_vm0, %v817_v57  ;;  %v904_v58 = vpop.permute.xlu2 %903 }
 0x129   :  { %1033 = vst.msk [vmem:[%s1777_s8 + $0x78] sm:$0xff] %vm759_vm0, %v904_v58 }
 0x12f   :  { %v900_v59 = vpop.permute.xlu0 %899  ;;  %v819_v60 = vpop.permute.xlu1 %818 }
 0x130   :  { %1031 = vst.msk [vmem:[%s1777_s8 + $0x58] sm:$0xff] %vm759_vm0, %v900_v59  ;;  %v809_v61 = vpop.permute.xlu2 %808 }
 0x131   :  { %1023 = vst.msk [vmem:[%s1776_s7 + $0xd8] sm:$0xff] %vm759_vm0, %v819_v60 }
 0x132   :  { %1018 = vst.msk [vmem:[%s1776_s7 + $0x88] sm:$0xff] %vm759_vm0, %v809_v61 }
 0x137   :  { %v902_v29 = vpop.permute.xlu1 %901  ;;  %v805_v62 = vpop.permute.xlu0 %804 }
 0x138   :  { %1032 = vst.msk [vmem:[%s1777_s8 + $0x68] sm:$0xff] %vm759_vm0, %v902_v29 }
 0x139   :  { %1016 = vst.msk [vmem:[%s1776_s7 + $0x68] sm:$0xff] %vm759_vm0, %v805_v62 }
 0x13b   :  { %v910_v63 = vpop.permute.xlu2 %909 }
 0x13c   :  { %1036 = vst.msk [vmem:[%s1777_s8 + $0xa8] sm:$0xff] %vm759_vm0, %v910_v63 }
 0x13f   :  { %v823_v0 = vpop.permute.xlu0 %822  ;;  %v807_v7 = vpop.permute.xlu1 %806 }
 0x140   :  { %1025 = vst.msk [vmem:[%s1776_s7 + $0xf8] sm:$0xff] %vm759_vm0, %v823_v0 }
 0x141   :  { %1017 = vst.msk [vmem:[%s1776_s7 + $0x78] sm:$0xff] %vm759_vm0, %v807_v7 }
 0x143   :  { %v815_v1 = vpop.permute.xlu2 %814 }
 0x144   :  { %1021 = vst.msk [vmem:[%s1776_s7 + $0xb8] sm:$0xff] %vm759_vm0, %v815_v1 }
 0x147   :  { %v906_v46 = vpop.permute.xlu0 %905  ;;  %v914_v23 = vpop.permute.xlu1 %913 }
 0x148   :  { %1034 = vst.msk [vmem:[%s1777_s8 + $0x88] sm:$0xff] %vm759_vm0, %v906_v46 }
 0x149   :  { %1038 = vst.msk [vmem:[%s1777_s8 + $0xc8] sm:$0xff] %vm759_vm0, %v914_v23 }
 0x14b   :  { %v916_v26 = vpop.permute.xlu2 %915 }
 0x14c   :  { %1039 = vst.msk [vmem:[%s1777_s8 + $0xd8] sm:$0xff] %vm759_vm0, %v916_v26 }
 0x14f   :  { %v908_v2 = vpop.permute.xlu1 %907  ;;  %v811_v3 = vpop.permute.xlu0 %810 }
 0x150   :  { %1035 = vst.msk [vmem:[%s1777_s8 + $0x98] sm:$0xff] %vm759_vm0, %v908_v2 }
 0x151   :  { %1019 = vst.msk [vmem:[%s1776_s7 + $0x98] sm:$0xff] %vm759_vm0, %v811_v3 }
 0x157   :  { %v813_v4 = vpop.permute.xlu1 %812 }
 0x158   :  { %1020 = vst.msk [vmem:[%s1776_s7 + $0xa8] sm:$0xff] %vm759_vm0, %v813_v4 }
 0x15b   :  { %v912_v5 = vpop.permute.xlu0 %911 }
 0x15c   :  { %1037 = vst.msk [vmem:[%s1777_s8 + $0xb8] sm:$0xff] %vm759_vm0, %v912_v5 }
 0x15f   :  { %v920_v8 = vpop.permute.xlu1 %919 }
 0x160   :  { %1041 = vst.msk [vmem:[%s1777_s8 + $0xf8] sm:$0xff] %vm759_vm0, %v920_v8 }
 0x163   :  { %v918_v9 = vpop.permute.xlu0 %917 }
 0x164   :  { %1040 = vst.msk [vmem:[%s1777_s8 + $0xe8] sm:$0xff] %vm759_vm0, %v918_v9 }

</bundles_post_ra>
